<compile_context>
chip_gen: v5e
topology: v5e:2x2
jax: 0.10.0
libtpu: 0.0.40
codegen_flags: <defaults>
</compile_context>

<pallas_src>
import functools
import math

import jax
import jax.numpy as jnp
import numpy as np
from jax.experimental import pallas as pl
from jax.experimental.pallas import tpu as pltpu


def _round_up(x: int, m: int) -> int:
    return ((x + m - 1) // m) * m


@functools.lru_cache(maxsize=None)
def _precompute(cep_order: int, fft_length: int, dtype_name: str):
    """Deterministic 'parameters' of the module: ramp-folded cosine basis (M+1, L/2+1).

    Cached so the host-side float64 cos table and the H2D upload happen once per
    (cep_order, fft_length, dtype) instead of on every call.
    """
    half = fft_length // 2
    m = np.arange(cep_order + 1, dtype=np.float64)
    k = np.arange(half + 1, dtype=np.float64)

    ramp = m * 0.5
    if cep_order == half:
        ramp[-1] *= 2.0

    # hfft cosine basis with Hermitian-symmetry doubling, ramp folded in.
    cos = np.cos(2.0 * math.pi * np.outer(m, k) / fft_length)
    w = np.full((cep_order + 1,), 2.0, dtype=np.float64)
    w[0] = 1.0
    if cep_order == half:
        w[-1] = 1.0
    basis = (ramp * w)[:, None] * cos  # (M+1, L/2+1), built in float64

    return jnp.asarray(basis, dtype=jnp.dtype(dtype_name))


def _c2ndps_kernel(c_ref, basis_ref, o_ref):
    # Pure MXU: (TM, M+1) @ (M+1, L/2+1) -> (TM, L/2+1), f32 accumulation, free
    # down-cast to the output dtype on the VPU (slack slot).
    o_ref[...] = jnp.dot(
        c_ref[...], basis_ref[...], preferred_element_type=jnp.float32
    ).astype(o_ref.dtype)


def _choose_row_tile(
    n_rows: int,
    cep_order: int,
    half_plus_one: int,
    in_itemsize: int,
    out_itemsize: int,
    basis_itemsize: int,
) -> int:
    """Largest MXU-friendly row tile that fits a conservative double-buffered VMEM budget."""
    rk = _round_up(cep_order + 1, 128)       # VMEM blocks are lane-padded to 128
    rh = _round_up(half_plus_one, 128)
    # The invariant basis still occupies two buffers; charge it against the budget.
    basis_bytes = 2 * _round_up(cep_order + 1, 8) * rh * basis_itemsize
    budget = max(8 << 20, (40 << 20) - basis_bytes)   # stays well under v7x's 64 MiB VMEM
    bytes_per_row = 2 * (rk * in_itemsize + rh * out_itemsize)  # double-buffered in + out
    cap = max(256, min(8192, (budget // bytes_per_row) // 256 * 256))
    if n_rows <= cap:
        if n_rows > 512:
            # Split so the "parallel" row axis distributes across v7x's two
            # TensorCores (harmless extra grid step on v5e/v6e).
            return _round_up(pl.cdiv(n_rows, 2), 8)
        return max(8, _round_up(n_rows, 8))
    return cap


def c2ndps(
    c: jax.Array,
    cep_order: int,
    fft_length: int,
    *,
    out_dtype=None,
    row_tile: int | None = None,
) -> jax.Array:
    """Convert cepstrum (..., M+1) to NDPS (..., L/2+1) via a Pallas TPU kernel."""
    assert 0 <= cep_order
    assert max(1, cep_order) <= fft_length // 2
    assert c.shape[-1] == cep_order + 1, "dimension of cepstrum mismatch"

    half_plus_one = fft_length // 2 + 1

    in_dtype = jnp.dtype(c.dtype)
    if in_dtype not in (jnp.dtype(jnp.bfloat16), jnp.dtype(jnp.float32)):
        in_dtype = jnp.dtype(jnp.float32)
    out_dtype = in_dtype if out_dtype is None else jnp.dtype(out_dtype)

    basis = _precompute(cep_order, fft_length, in_dtype.name)

    batch_shape = c.shape[:-1]
    n_rows = int(np.prod(batch_shape)) if batch_shape else 1
    c2d = c.reshape(n_rows, cep_order + 1).astype(in_dtype)

    tm = row_tile if row_tile is not None else _choose_row_tile(
        n_rows, cep_order, half_plus_one,
        in_dtype.itemsize, out_dtype.itemsize, basis.dtype.itemsize,
    )
    assert tm % 8 == 0
    num_tiles = pl.cdiv(n_rows, tm)  # ragged last block is clipped/masked by Pallas

    # Scoped-VMEM limit sized to the actual (lane-padded) footprint + headroom, so
    # larger tiles are not rejected by the default scoped limit (16 MiB on v5e).
    rk = _round_up(cep_order + 1, 128)
    rh = _round_up(half_plus_one, 128)
    footprint = (
        2 * tm * rk * in_dtype.itemsize          # double-buffered input tile
        + 2 * tm * rh * out_dtype.itemsize       # double-buffered output tile
        + 2 * _round_up(cep_order + 1, 8) * rh * basis.dtype.itemsize
        + (2 << 20)                              # headroom
    )
    vmem_limit = int(min(max(footprint, 32 << 20), 60 << 20))

    cost = pl.CostEstimate(
        flops=2 * n_rows * (cep_order + 1) * half_plus_one,
        transcendentals=0,
        bytes_accessed=(
            n_rows * (cep_order + 1) * in_dtype.itemsize
            + (cep_order + 1) * half_plus_one * basis.dtype.itemsize
            + n_rows * half_plus_one * out_dtype.itemsize
        ),
    )

    # TODO(synk): for very small FFT sizes (L <= 254 so H < 128) a transposed,
    # lane-dense output layout (H on sublanes, rows on lanes) would avoid masked
    # vst.msk stores; not implemented here.
    out = pl.pallas_call(
        _c2ndps_kernel,
        out_shape=jax.ShapeDtypeStruct((n_rows, half_plus_one), out_dtype),
        grid=(num_tiles,),
        in_specs=[
            pl.BlockSpec((tm, cep_order + 1), lambda i: (i, 0)),
            # Basis is grid-invariant: same block every step, so no re-fetch.
            pl.BlockSpec((cep_order + 1, half_plus_one), lambda i: (0, 0)),
        ],
        out_specs=pl.BlockSpec((tm, half_plus_one), lambda i: (i, 0)),
        compiler_params=pltpu.CompilerParams(
            dimension_semantics=("parallel",),
            vmem_limit_bytes=vmem_limit,
        ),
        cost_estimate=cost,
    )(c2d, basis)

    return out.reshape(*batch_shape, half_plus_one)


def _reference(c, cep_order, fft_length):
    ramp = np.arange(cep_order + 1, dtype=np.float64) * 0.5
    if cep_order == fft_length // 2:
        ramp[-1] *= 2.0
    v = np.asarray(c, dtype=np.float64) * ramp
    return np.fft.hfft(v, n=fft_length)[..., : fft_length // 2 + 1]


if __name__ == "__main__":
    # Small, module-consistent shapes: batch (2, 4), cep_order M=7, fft_length L=16.
    cep_order = 7
    fft_length = 16

    key = jax.random.PRNGKey(0)
    c = jax.random.normal(key, (2, 4, cep_order + 1), dtype=jnp.float32)

    n = jax.block_until_ready(c2ndps(c, cep_order, fft_length))
    assert n.shape == (2, 4, fft_length // 2 + 1)
    np.testing.assert_allclose(
        np.asarray(n), _reference(c, cep_order, fft_length), rtol=1e-3, atol=1e-3
    )

    # Docstring example: c = [0,1,2,3,4], M=4, L=8 (exercises the Nyquist case).
    c_doc = jnp.arange(5, dtype=jnp.float32)
    n_doc = jax.block_until_ready(c2ndps(c_doc, 4, 8))
    np.testing.assert_allclose(
        np.asarray(n_doc),
        np.array([30.0, -21.6569, 12.0, -10.3431, 10.0]),
        rtol=1e-3,
        atol=1e-3,
    )

    # Ragged last block, no host-side pad/slice: n_rows = 21 with row_tile = 8.
    c_rag = jax.random.normal(jax.random.PRNGKey(1), (3, 7, cep_order + 1), jnp.float32)
    n_rag = jax.block_until_ready(c2ndps(c_rag, cep_order, fft_length, row_tile=8))
    np.testing.assert_allclose(
        np.asarray(n_rag), _reference(c_rag, cep_order, fft_length), rtol=1e-3, atol=1e-3
    )

    # Medium batch: exercises the >=2-tile split that feeds both v7x TensorCores.
    c_med = jax.random.normal(jax.random.PRNGKey(2), (600, cep_order + 1), jnp.float32)
    n_med = jax.block_until_ready(c2ndps(c_med, cep_order, fft_length))
    np.testing.assert_allclose(
        np.asarray(n_med), _reference(c_med, cep_order, fft_length), rtol=1e-3, atol=1e-3
    )

    # bf16 I/O path: bf16 LHS + bf16 basis, f32 accumulation, bf16 output.
    c_bf16 = jax.random.normal(jax.random.PRNGKey(3), (2, 4, cep_order + 1), jnp.bfloat16)
    n_bf16 = jax.block_until_ready(c2ndps(c_bf16, cep_order, fft_length))
    assert n_bf16.dtype == jnp.bfloat16
    np.testing.assert_allclose(
        np.asarray(n_bf16.astype(jnp.float32)),
        _reference(np.asarray(c_bf16.astype(jnp.float32)), cep_order, fft_length),
        rtol=5e-2,
        atol=3e-1,
    )

    print("KERNEL_OK")
</pallas_src>

<mosaic_0001>
module attributes {stable_mosaic.version = 11 : i64} {
  func.func @_c2ndps_kernel(%arg0: i32, %arg1: memref<8x8xf32, #tpu.memory_space<vmem>>, %arg2: memref<8x9xf32, #tpu.memory_space<vmem>>, %arg3: memref<8x9xf32, #tpu.memory_space<vmem>>) attributes {dimension_semantics = [#tpu.dimension_semantics<parallel>], iteration_bounds = array<i64: 1>, scalar_prefetch = 0 : i64, scratch_operands = 0 : i64, tpu.core_type = #tpu.core_type<tc>, window_params = [{transform_indices = @transform_0, window_bounds = array<i64: 8, 8>}, {pipeline_mode = #tpu.pipeline_mode<synchronous>, transform_indices = @transform_1, window_bounds = array<i64: 8, 9>}, {transform_indices = @transform_2, window_bounds = array<i64: 8, 9>}]} {
    %c0 = arith.constant 0 : index
    %c0_0 = arith.constant 0 : index
    %0 = vector.load %arg1[%c0, %c0_0] : memref<8x8xf32, #tpu.memory_space<vmem>>, vector<8x8xf32>
    %c0_1 = arith.constant 0 : index
    %c0_2 = arith.constant 0 : index
    %1 = vector.load %arg2[%c0_1, %c0_2] : memref<8x9xf32, #tpu.memory_space<vmem>>, vector<8x9xf32>
    %cst = arith.constant dense<0.000000e+00> : vector<8x9xf32>
    %2 = tpu.matmul %0, %1, %cst {dimension_numbers = #tpu.dot_dimension_numbers<[1], [0], [0], [1], [0, 0, 1, 1], [], []>} : vector<8x8xf32>, vector<8x9xf32>, vector<8x9xf32> -> vector<8x9xf32>
    %c0_3 = arith.constant 0 : index
    %c0_4 = arith.constant 0 : index
    %3 = vector.load %arg3[%c0_3, %c0_4] : memref<8x9xf32, #tpu.memory_space<vmem>>, vector<8x9xf32>
    tpu.vector_store %arg3[%c0_3, %c0_4], %2 {strides = array<i32>} : memref<8x9xf32, #tpu.memory_space<vmem>>, vector<8x9xf32>,
    return
  }
  func.func @transform_0(%arg0: i32) -> (i32, i32) {
    %c0_i32 = arith.constant 0 : i32
    %c0_i32_0 = arith.constant 0 : i32
    return %arg0, %c0_i32 : i32, i32
  }
  func.func @transform_1(%arg0: i32) -> (i32, i32) {
    %c0_i32 = arith.constant 0 : i32
    %c0_i32_0 = arith.constant 0 : i32
    %c0_i32_1 = arith.constant 0 : i32
    return %c0_i32, %c0_i32_0 : i32, i32
  }
  func.func @transform_2(%arg0: i32) -> (i32, i32) {
    %c0_i32 = arith.constant 0 : i32
    %c0_i32_0 = arith.constant 0 : i32
    return %arg0, %c0_i32 : i32, i32
  }
}

</mosaic_0001>

<bundles_post_ra>
// kernel: tpu_custom_call.1
= control target key start
LH: loop header
LB: loop body
LE: loop exit
PB: predicated region body
PF: predicated region fallthrough
CT: control target
= control target key end

     0   :  { %7 = vsyncpa [#allocation3], 0  ;;  %s195_s0 = inlined_call_operand.hbm [shape: f32[8,8], index: 0, kind: input, shape index: {}]   ;;  %s196_s1 = inlined_call_operand.hbm [shape: f32[8,9], index: 1, kind: input, shape index: {}]   ;;  %s197_s2 = inlined_call_operand.hbm [shape: f32[8,9], index: 2, kind: output, shape index: {}]  }
   0x1   :  { %8 = vsyncpa [#allocation6], 0 }
   0x2   :  { %9 = vsyncpa [#allocation4], 0  ;;  %s15_s11 = sshll.u32 %s195_s0, 4  ;;  %s168_s12 = smov [#allocation2]   ;;  %s16_s11 = int_to_ptr.hbm [resolvable:$true] %s15_s11 }
   0x3   :  { %s17_s13 = sshll.u32 %s168_s12, 4  ;;  %s26_s16 = sshll.u32 %s196_s1, 4  ;;  %s18_s13 = int_to_ptr.vmem [resolvable:$true] %s17_s13  ;;  %s27_s16 = int_to_ptr.hbm [resolvable:$true] %s26_s16 }
   0x4   :  { %20 = dma.hbm_to_vmem [thread:$0]  %s16_s11, 128, %s18_s13, [#allocation3]  }
   0x5   :  { %s169_s17 = smov [#allocation5]  }
   0x6   :  { %s28_s18 = sshll.u32 %s169_s17, 4  ;;  %s29_s18 = int_to_ptr.vmem [resolvable:$true] %s28_s18 }
   0x7   :  { %31 = dma.hbm_to_vmem [thread:$0]  %s27_s16, 128, %s29_s18, [#allocation6]  }
   0x8   :  { %162 = dma.done.wait [#allocation3], 128  }
   0x9   :  { %163 = vsyncadd [#allocation3], 4294967168 }
   0xa   :  { %164 = dma.done.wait [#allocation6], 128  }
   0xb   :  { %165 = vsyncadd [#allocation6], 4294967168  ;;  %vm42_vm0 = vcmask 64512   ;;  %v41_v0 = vld [vmem:[#allocation5] sm:$0xff]  ;;  %v40_v1 = vld [vmem:[#allocation2] sm:$0xff]  ;;  %s170_s0 = smov [#allocation7]  }
   0xc   :  { %61 = vmatpush.msra.mxu0 %v41_v0  ;;  %s73_s19 = sshll.u32 %s170_s0, 4  ;;  %s75_s1 = sshll.u32 %s197_s2, 4  ;;  %vm66_vm1 = vcmask 72704   ;;  %s74_s19 = int_to_ptr.vmem [resolvable:$true] %s73_s19  ;;  %s76_s1 = int_to_ptr.hbm [resolvable:$true] %s75_s1 }
   0xd   :  { %86 = vmatmul.msk.f32.vlgmr.msra.gmra.mxu0 %vm42_vm0, %v40_v1 }
  0x8a   :  { %v63_v2 = vpop.f32.mrf.mxu0 }
  0x8b   :  { %67 = vst.msk [vmem:[#allocation7] sm:$0xff] %vm66_vm1, %v63_v2 }
  0x8c   :  { %78 = dma.vmem_to_hbm [thread:$0]  %s74_s19, 128, %s76_s1, [#allocation4]  }
  0x8d   :  { %166 = dma.done.wait [#allocation4], 128  }
  0x8e   :  { %167 = vsyncadd [#allocation4], 4294967168 }
  0x8f   :  { %83 = vsyncpa [#allocation3], 1 }
  0x90   :  { %84 = vsyncpa [#allocation6], 1 }
  0x91   :  { %85 = vsyncpa [#allocation4], 1 }

</bundles_post_ra>
